<compile_context>
chip_gen: v7x
topology: tpu7x:2x2x1
jax: 0.10.0
libtpu: 0.0.40
codegen_flags: <defaults>
</compile_context>

<pallas_src>
import functools

import jax
import jax.numpy as jnp
from jax import lax
from jax.experimental import pallas as pl
from jax.experimental.pallas import tpu as pltpu


def head_kernel(x_ref, w1_ref, b1_ref, w2_ref, b2_ref,
                out_ref, feat_ref, acc_ref, *, inv_hw, tb, c):
    """Grid = (batch tiles, spatial chunks); the spatial axis is the reduction."""
    s = pl.program_id(1)

    # Zero the lane-shaped per-row accumulator at the start of each batch tile.
    @pl.when(s == 0)
    def _init():
        acc_ref[...] = jnp.zeros_like(acc_ref)

    # Streamed chunk: (TB*C, THW).  Reduce it with a lane-aligned pairwise tree
    # of pure-VPU adds; the single cross-lane (XLU) reduce is deferred to the
    # finalize branch so it is not issued once per chunk.
    x = x_ref[...].astype(jnp.float32)
    parts = [x[:, k * 128:(k + 1) * 128] for k in range(x.shape[-1] // 128)]
    while len(parts) > 1:
        nxt = [parts[i] + parts[i + 1] for i in range(0, len(parts) - 1, 2)]
        if len(parts) % 2:
            nxt.append(parts[-1])
        parts = nxt
    acc_ref[...] += parts[0]                                    # (TB*C, 128)

    # Finalize once per batch tile: mean -> Linear -> LeakyReLU -> Linear.
    @pl.when(s == pl.num_programs(1) - 1)
    def _finalize():
        # Fold the flat (TB*C, 128) accumulator into the (TB, C) pooled means.
        # Channel ch occupies rows ch, ch+C, ch+2C, ... (sublane-strided read),
        # one cross-lane reduce per channel, placed into lane ch via a one-hot
        # select (pure VPU broadcast; avoids unaligned lane concatenates).
        lane_id = lax.broadcasted_iota(jnp.int32, (tb, c), 1)
        feat = jnp.zeros((tb, c), jnp.float32)
        for ch in range(c):
            rows = acc_ref[pl.ds(ch, tb, stride=c), :]           # (TB, 128)
            col = jnp.sum(rows, axis=-1, keepdims=True)          # (TB, 1)
            feat = jnp.where(lane_id == ch, col, feat)
        feat = feat * inv_hw                                     # AdaptiveAvgPool2d(1)

        h = jnp.dot(feat, w1_ref[...],
                    preferred_element_type=jnp.float32) + b1_ref[...]
        h = jnp.where(h > 0, h, 0.01 * h)                        # LeakyReLU(0.01)
        o = jnp.dot(h, w2_ref[...],
                    preferred_element_type=jnp.float32) + b2_ref[...]
        # Dropout(0.2): identity in eval mode (see module-level TODO).
        out_ref[...] = o.astype(out_ref.dtype)
        feat_ref[...] = feat.astype(feat_ref.dtype)


def _round_up(x, m):
    return ((x + m - 1) // m) * m


def _pick_tile(total, base, cap):
    """Largest multiple of `base` that divides `total` and is <= cap.

    `total` is always a multiple of `base` here (wrapper pads first).
    """
    best = base
    t = base
    cap = min(cap, total)
    while t <= cap:
        if total % t == 0:
            best = t
        t += base
    return best


def head_forward(x_nchw, w1, b1, w2, b2, *, b_tile=None, hw_tile=None,
                 stream_dtype=None):
    """x_nchw: (B, C, H, W).  Returns (out (B, out_f) f32, feat (B, C) f32).

    Weights must be in (in, out) layout: transpose PyTorch nn.Linear's
    (out, in) weights before calling.  Set stream_dtype=jnp.bfloat16 to halve
    HBM traffic for the x stream (accumulation/output stay float32).
    """
    B, C, H, W = x_nchw.shape
    HW = H * W
    assert w1.ndim == 2 and w1.shape[0] == C, \
        "w1 must be (in_f, hidden); transpose PyTorch's (out, in) layout"
    hidden = w1.shape[1]
    assert w2.ndim == 2 and w2.shape[0] == hidden, \
        "w2 must be (hidden, out_f); transpose PyTorch's (out, in) layout"
    out_f = w2.shape[1]

    w1 = jnp.asarray(w1, jnp.float32)
    w2 = jnp.asarray(w2, jnp.float32)
    b1 = jnp.asarray(b1, jnp.float32).reshape(1, hidden)
    b2 = jnp.asarray(b2, jnp.float32).reshape(1, out_f)

    # Pad to lane/sublane-dense extents.  Zero pads keep the mean exact
    # (inv_hw uses the true HW); padded batch rows are sliced off at the end.
    HWp = _round_up(HW, 128)
    Bp = _round_up(B, 8)

    x3 = x_nchw.reshape(B, C, HW)
    if (Bp, HWp) != (B, HW):
        x3 = jnp.pad(x3, ((0, Bp - B), (0, 0), (0, HWp - HW)))
    x2d = x3.reshape(Bp * C, HWp)            # free reshape of contiguous NCHW
    if stream_dtype is not None:
        x2d = x2d.astype(stream_dtype)
    itemsize = jnp.dtype(x2d.dtype).itemsize

    # --- Tile selection -----------------------------------------------------
    TILE_BYTES = 4 << 20                      # per x buffer (double-buffered)
    if hw_tile is not None:
        THW = hw_tile
    else:
        THW = _pick_tile(HWp, 128, 4096)      # large spatial tiles: HBM roofline
    assert HWp % THW == 0 and THW % 128 == 0, "hw_tile must divide padded HW, %128"

    if b_tile is not None:
        TB = b_tile
    else:
        rows_cap = max(8, (TILE_BYTES // max(1, C * THW * itemsize)) // 8 * 8)
        cap = min(rows_cap, 256)
        # v7x: keep >=2 batch tiles when B permits so both TensorCores stream.
        if Bp % 16 == 0:
            cap = min(cap, Bp // 2)
        TB = _pick_tile(Bp, 8, cap)
    assert Bp % TB == 0 and TB % 8 == 0, "b_tile must divide padded B and be %8"

    nb, ns = Bp // TB, HWp // THW
    TBC = TB * C

    kernel = functools.partial(head_kernel, inv_hw=1.0 / float(HW), tb=TB, c=C)

    cost = pl.CostEstimate(
        flops=2 * Bp * (C * hidden + hidden * out_f) + Bp * C * HWp,
        transcendentals=0,
        bytes_accessed=(Bp * C * HWp * itemsize                       # x stream
                        + (C * hidden + hidden + hidden * out_f + out_f) * 4
                        + (Bp * out_f + Bp * C) * 4),                 # outputs
    )

    out_p, feat_p = pl.pallas_call(
        kernel,
        out_shape=(
            jax.ShapeDtypeStruct((Bp, out_f), jnp.float32),
            jax.ShapeDtypeStruct((Bp, C), jnp.float32),
        ),
        grid_spec=pltpu.PrefetchScalarGridSpec(
            num_scalar_prefetch=0,
            grid=(nb, ns),                                 # reduction axis last
            in_specs=[
                # Streamed, double-buffered, sublane/lane-dense x tiles.
                pl.BlockSpec((TBC, THW), lambda b, s: (b, s)),
                # Weights/biases: constant block index -> VMEM-resident.
                pl.BlockSpec((C, hidden), lambda b, s: (0, 0)),
                pl.BlockSpec((1, hidden), lambda b, s: (0, 0)),
                pl.BlockSpec((hidden, out_f), lambda b, s: (0, 0)),
                pl.BlockSpec((1, out_f), lambda b, s: (0, 0)),
            ],
            out_specs=(
                # Same block index across the spatial axis -> outputs stay
                # resident and are written once on the final spatial step.
                pl.BlockSpec((TB, out_f), lambda b, s: (b, 0)),
                pl.BlockSpec((TB, C), lambda b, s: (b, 0)),
            ),
            scratch_shapes=[pltpu.VMEM((TBC, 128), jnp.float32)],
        ),
        compiler_params=pltpu.CompilerParams(
            dimension_semantics=("parallel", "arbitrary"),
            vmem_limit_bytes=32 << 20,
        ),
        cost_estimate=cost,
    )(x2d, w1, b1, w2, b2)

    return out_p[:B], feat_p[:B]


if __name__ == "__main__":
    # Small shapes consistent with the module: in_f = C = 4, hidden = 32, out_f = 8.
    B, C, H, W = 2, 4, 16, 16
    hidden_dim, out_f = 32, 8

    key = jax.random.PRNGKey(0)
    kx, k1, k2, k3, k4 = jax.random.split(key, 5)

    x = jax.random.normal(kx, (B, C, H, W), dtype=jnp.float32)
    # Weights stored as (in, out) so jnp.dot maps directly onto the MXU
    # (transpose of PyTorch nn.Linear's (out, in) layout).
    w1 = jax.random.normal(k1, (C, hidden_dim), dtype=jnp.float32) * 0.1
    b1 = jax.random.normal(k2, (hidden_dim,), dtype=jnp.float32) * 0.1
    w2 = jax.random.normal(k3, (hidden_dim, out_f), dtype=jnp.float32) * 0.1
    b2 = jax.random.normal(k4, (out_f,), dtype=jnp.float32) * 0.1

    # Pure-JAX reference.
    feat_ref = jnp.mean(x.reshape(B, C, -1), axis=-1)
    h_ref = feat_ref @ w1 + b1
    h_ref = jnp.where(h_ref > 0, h_ref, 0.01 * h_ref)
    out_ref = h_ref @ w2 + b2

    # f32 streaming (exact PyTorch-f32 semantics); hw_tile=128 forces a
    # 2-step spatial reduction so the pipelined accumulator path is exercised.
    out, feat = head_forward(x, w1, b1, w2, b2, hw_tile=128)
    jax.block_until_ready((out, feat))
    assert out.shape == (B, out_f) and feat.shape == (B, C)
    assert jnp.allclose(out, out_ref, atol=1e-5), "mlp output mismatch"
    assert jnp.allclose(feat, feat_ref, atol=1e-5), "pooled feature mismatch"

    # bfloat16 streaming (halves HBM traffic of the bandwidth-bound x stream);
    # inputs are rounded to bf16 before the f32 accumulation, so use a looser
    # tolerance against the f32 reference.
    out_bf, feat_bf = head_forward(x, w1, b1, w2, b2, hw_tile=128,
                                   stream_dtype=jnp.bfloat16)
    jax.block_until_ready((out_bf, feat_bf))
    assert jnp.allclose(out_bf, out_ref, atol=2e-2), "bf16 mlp output mismatch"
    assert jnp.allclose(feat_bf, feat_ref, atol=2e-2), "bf16 feature mismatch"

    print("KERNEL_OK")
</pallas_src>

<mosaic_0001>
module attributes {stable_mosaic.version = 11 : i64} {
  func.func @head_kernel(%arg0: i32, %arg1: i32, %arg2: memref<32x128xf32, #tpu.memory_space<vmem>>, %arg3: memref<4x32xf32, #tpu.memory_space<vmem>>, %arg4: memref<1x32xf32, #tpu.memory_space<vmem>>, %arg5: memref<32x8xf32, #tpu.memory_space<vmem>>, %arg6: memref<1x8xf32, #tpu.memory_space<vmem>>, %arg7: memref<8x8xf32, #tpu.memory_space<vmem>>, %arg8: memref<8x4xf32, #tpu.memory_space<vmem>>, %arg9: memref<32x128xf32, #tpu.memory_space<vmem>>) attributes {dimension_semantics = [#tpu.dimension_semantics<parallel>, #tpu.dimension_semantics<arbitrary>], iteration_bounds = array<i64: 1, 2>, scalar_prefetch = 0 : i64, scratch_operands = 1 : i64, tpu.core_type = #tpu.core_type<tc>, window_params = [{transform_indices = @transform_0, window_bounds = array<i64: 32, 128>}, {pipeline_mode = #tpu.pipeline_mode<synchronous>, transform_indices = @transform_1, window_bounds = array<i64: 4, 32>}, {pipeline_mode = #tpu.pipeline_mode<synchronous>, transform_indices = @transform_2, window_bounds = array<i64: 1, 32>}, {pipeline_mode = #tpu.pipeline_mode<synchronous>, transform_indices = @transform_3, window_bounds = array<i64: 32, 8>}, {pipeline_mode = #tpu.pipeline_mode<synchronous>, transform_indices = @transform_4, window_bounds = array<i64: 1, 8>}, {transform_indices = @transform_5, window_bounds = array<i64: 8, 8>}, {transform_indices = @transform_6, window_bounds = array<i64: 8, 4>}]} {
    %c0_i32 = arith.constant 0 : i32
    %0 = arith.cmpi eq, %arg1, %c0_i32 : i32
    %1 = arith.extui %0 : i1 to i32
    %c0_i32_0 = arith.constant 0 : i32
    %2 = arith.cmpi ne, %1, %c0_i32_0 : i32
    scf.if %2 {
      %cst = arith.constant 0.000000e+00 : f32
      %10 = vector.broadcast %cst : f32 to vector<32x128xf32>
      %c0_7 = arith.constant 0 : index
      %c0_8 = arith.constant 0 : index
      %11 = vector.load %arg9[%c0_7, %c0_8] : memref<32x128xf32, #tpu.memory_space<vmem>>, vector<32x128xf32>
      tpu.vector_store %arg9[%c0_7, %c0_8], %10 {strides = array<i32>} : memref<32x128xf32, #tpu.memory_space<vmem>>, vector<32x128xf32>,
    } else {
    }
    %c0 = arith.constant 0 : index
    %c0_1 = arith.constant 0 : index
    %3 = vector.load %arg2[%c0, %c0_1] : memref<32x128xf32, #tpu.memory_space<vmem>>, vector<32x128xf32>
    %c0_2 = arith.constant 0 : index
    %c0_3 = arith.constant 0 : index
    %4 = vector.load %arg9[%c0_2, %c0_3] : memref<32x128xf32, #tpu.memory_space<vmem>>, vector<32x128xf32>
    %5 = arith.addf %4, %3 : vector<32x128xf32>
    %c0_4 = arith.constant 0 : index
    %c0_5 = arith.constant 0 : index
    %6 = vector.load %arg9[%c0_4, %c0_5] : memref<32x128xf32, #tpu.memory_space<vmem>>, vector<32x128xf32>
    tpu.vector_store %arg9[%c0_4, %c0_5], %5 {strides = array<i32>} : memref<32x128xf32, #tpu.memory_space<vmem>>, vector<32x128xf32>,
    %c1_i32 = arith.constant 1 : i32
    %7 = arith.cmpi eq, %arg1, %c1_i32 : i32
    %8 = arith.extui %7 : i1 to i32
    %c0_i32_6 = arith.constant 0 : i32
    %9 = arith.cmpi ne, %8, %c0_i32_6 : i32
    scf.if %9 {
      %10 = tpu.iota {dimensions = array<i32: 1>} : vector<8x4xi32>
      %cst = arith.constant 0.000000e+00 : f32
      %11 = vector.broadcast %cst : f32 to vector<8x4xf32>
      %c0_7 = arith.constant 0 : index
      %c0_8 = arith.constant 0 : index
      %12 = tpu.strided_load %arg9[%c0_7, %c0_8] {strides = array<i32: 4, 1>} : memref<32x128xf32, #tpu.memory_space<vmem>>, vector<8x128xf32>
      %cst_9 = arith.constant dense<0.000000e+00> : vector<8xf32>
      %13 = vector.multi_reduction <add>, %12, %cst_9 [1] : vector<8x128xf32> to vector<8xf32>
      %14 = vector.shape_cast %13 : vector<8xf32> to vector<8x1xf32>
      %c0_i32_10 = arith.constant 0 : i32
      %15 = vector.broadcast %c0_i32_10 : i32 to vector<8x4xi32>
      %16 = arith.cmpi eq, %10, %15 : vector<8x4xi32>
      %17 = vector.shape_cast %14 : vector<8x1xf32> to vector<8x1xf32>
      %18 = vector.broadcast %17 : vector<8x1xf32> to vector<8x4xf32>
      %19 = arith.select %16, %18, %11 : vector<8x4xi1>, vector<8x4xf32>
      %c1 = arith.constant 1 : index
      %c0_11 = arith.constant 0 : index
      %20 = tpu.strided_load %arg9[%c1, %c0_11] {strides = array<i32: 4, 1>} : memref<32x128xf32, #tpu.memory_space<vmem>>, vector<8x128xf32>
      %cst_12 = arith.constant dense<0.000000e+00> : vector<8xf32>
      %21 = vector.multi_reduction <add>, %20, %cst_12 [1] : vector<8x128xf32> to vector<8xf32>
      %22 = vector.shape_cast %21 : vector<8xf32> to vector<8x1xf32>
      %c1_i32_13 = arith.constant 1 : i32
      %23 = vector.broadcast %c1_i32_13 : i32 to vector<8x4xi32>
      %24 = arith.cmpi eq, %10, %23 : vector<8x4xi32>
      %25 = vector.shape_cast %22 : vector<8x1xf32> to vector<8x1xf32>
      %26 = vector.broadcast %25 : vector<8x1xf32> to vector<8x4xf32>
      %27 = arith.select %24, %26, %19 : vector<8x4xi1>, vector<8x4xf32>
      %c2 = arith.constant 2 : index
      %c0_14 = arith.constant 0 : index
      %28 = tpu.strided_load %arg9[%c2, %c0_14] {strides = array<i32: 4, 1>} : memref<32x128xf32, #tpu.memory_space<vmem>>, vector<8x128xf32>
      %cst_15 = arith.constant dense<0.000000e+00> : vector<8xf32>
      %29 = vector.multi_reduction <add>, %28, %cst_15 [1] : vector<8x128xf32> to vector<8xf32>
      %30 = vector.shape_cast %29 : vector<8xf32> to vector<8x1xf32>
      %c2_i32 = arith.constant 2 : i32
      %31 = vector.broadcast %c2_i32 : i32 to vector<8x4xi32>
      %32 = arith.cmpi eq, %10, %31 : vector<8x4xi32>
      %33 = vector.shape_cast %30 : vector<8x1xf32> to vector<8x1xf32>
      %34 = vector.broadcast %33 : vector<8x1xf32> to vector<8x4xf32>
      %35 = arith.select %32, %34, %27 : vector<8x4xi1>, vector<8x4xf32>
      %c3 = arith.constant 3 : index
      %c0_16 = arith.constant 0 : index
      %36 = tpu.strided_load %arg9[%c3, %c0_16] {strides = array<i32: 4, 1>} : memref<32x128xf32, #tpu.memory_space<vmem>>, vector<8x128xf32>
      %cst_17 = arith.constant dense<0.000000e+00> : vector<8xf32>
      %37 = vector.multi_reduction <add>, %36, %cst_17 [1] : vector<8x128xf32> to vector<8xf32>
      %38 = vector.shape_cast %37 : vector<8xf32> to vector<8x1xf32>
      %c3_i32 = arith.constant 3 : i32
      %39 = vector.broadcast %c3_i32 : i32 to vector<8x4xi32>
      %40 = arith.cmpi eq, %10, %39 : vector<8x4xi32>
      %41 = vector.shape_cast %38 : vector<8x1xf32> to vector<8x1xf32>
      %42 = vector.broadcast %41 : vector<8x1xf32> to vector<8x4xf32>
      %43 = arith.select %40, %42, %35 : vector<8x4xi1>, vector<8x4xf32>
      %cst_18 = arith.constant 3.906250e-03 : f32
      %44 = vector.broadcast %cst_18 : f32 to vector<8x4xf32>
      %45 = arith.mulf %43, %44 : vector<8x4xf32>
      %c0_19 = arith.constant 0 : index
      %c0_20 = arith.constant 0 : index
      %46 = vector.load %arg3[%c0_19, %c0_20] : memref<4x32xf32, #tpu.memory_space<vmem>>, vector<4x32xf32>
      %cst_21 = arith.constant dense<0.000000e+00> : vector<8x32xf32>
      %47 = tpu.matmul %45, %46, %cst_21 {dimension_numbers = #tpu.dot_dimension_numbers<[1], [0], [0], [1], [0, 0, 1, 1], [], []>} : vector<8x4xf32>, vector<4x32xf32>, vector<8x32xf32> -> vector<8x32xf32>
      %c0_22 = arith.constant 0 : index
      %c0_23 = arith.constant 0 : index
      %48 = vector.load %arg4[%c0_22, %c0_23] : memref<1x32xf32, #tpu.memory_space<vmem>>, vector<1x32xf32>
      %49 = vector.broadcast %48 : vector<1x32xf32> to vector<8x32xf32>
      %50 = arith.addf %47, %49 : vector<8x32xf32>
      %cst_24 = arith.constant 0.000000e+00 : f32
      %51 = vector.broadcast %cst_24 : f32 to vector<8x32xf32>
      %52 = arith.cmpf ogt, %50, %51 : vector<8x32xf32>
      %cst_25 = arith.constant 0.00999999977 : f32
      %53 = vector.broadcast %cst_25 : f32 to vector<8x32xf32>
      %54 = arith.mulf %53, %50 : vector<8x32xf32>
      %55 = arith.select %52, %50, %54 : vector<8x32xi1>, vector<8x32xf32>
      %c0_26 = arith.constant 0 : index
      %c0_27 = arith.constant 0 : index
      %56 = vector.load %arg5[%c0_26, %c0_27] : memref<32x8xf32, #tpu.memory_space<vmem>>, vector<32x8xf32>
      %cst_28 = arith.constant dense<0.000000e+00> : vector<8x8xf32>
      %57 = tpu.matmul %55, %56, %cst_28 {dimension_numbers = #tpu.dot_dimension_numbers<[1], [0], [0], [1], [0, 0, 1, 1], [], []>} : vector<8x32xf32>, vector<32x8xf32>, vector<8x8xf32> -> vector<8x8xf32>
      %c0_29 = arith.constant 0 : index
      %c0_30 = arith.constant 0 : index
      %58 = vector.load %arg6[%c0_29, %c0_30] : memref<1x8xf32, #tpu.memory_space<vmem>>, vector<1x8xf32>
      %59 = vector.broadcast %58 : vector<1x8xf32> to vector<8x8xf32>
      %60 = arith.addf %57, %59 : vector<8x8xf32>
      %c0_31 = arith.constant 0 : index
      %c0_32 = arith.constant 0 : index
      %61 = vector.load %arg7[%c0_31, %c0_32] : memref<8x8xf32, #tpu.memory_space<vmem>>, vector<8x8xf32>
      tpu.vector_store %arg7[%c0_31, %c0_32], %60 {strides = array<i32>} : memref<8x8xf32, #tpu.memory_space<vmem>>, vector<8x8xf32>,
      %c0_33 = arith.constant 0 : index
      %c0_34 = arith.constant 0 : index
      %62 = vector.load %arg8[%c0_33, %c0_34] : memref<8x4xf32, #tpu.memory_space<vmem>>, vector<8x4xf32>
      tpu.vector_store %arg8[%c0_33, %c0_34], %45 {strides = array<i32>} : memref<8x4xf32, #tpu.memory_space<vmem>>, vector<8x4xf32>,
    } else {
    }
    return
  }
  func.func @transform_0(%arg0: i32, %arg1: i32) -> (i32, i32) {
    %c0_i32 = arith.constant 0 : i32
    return %arg0, %arg1 : i32, i32
  }
  func.func @transform_1(%arg0: i32, %arg1: i32) -> (i32, i32) {
    %c0_i32 = arith.constant 0 : i32
    %c0_i32_0 = arith.constant 0 : i32
    %c0_i32_1 = arith.constant 0 : i32
    return %c0_i32, %c0_i32_0 : i32, i32
  }
  func.func @transform_2(%arg0: i32, %arg1: i32) -> (i32, i32) {
    %c0_i32 = arith.constant 0 : i32
    %c0_i32_0 = arith.constant 0 : i32
    %c0_i32_1 = arith.constant 0 : i32
    return %c0_i32, %c0_i32_0 : i32, i32
  }
  func.func @transform_3(%arg0: i32, %arg1: i32) -> (i32, i32) {
    %c0_i32 = arith.constant 0 : i32
    %c0_i32_0 = arith.constant 0 : i32
    %c0_i32_1 = arith.constant 0 : i32
    return %c0_i32, %c0_i32_0 : i32, i32
  }
  func.func @transform_4(%arg0: i32, %arg1: i32) -> (i32, i32) {
    %c0_i32 = arith.constant 0 : i32
    %c0_i32_0 = arith.constant 0 : i32
    %c0_i32_1 = arith.constant 0 : i32
    return %c0_i32, %c0_i32_0 : i32, i32
  }
  func.func @transform_5(%arg0: i32, %arg1: i32) -> (i32, i32) {
    %c0_i32 = arith.constant 0 : i32
    %c0_i32_0 = arith.constant 0 : i32
    return %arg0, %c0_i32 : i32, i32
  }
  func.func @transform_6(%arg0: i32, %arg1: i32) -> (i32, i32) {
    %c0_i32 = arith.constant 0 : i32
    %c0_i32_0 = arith.constant 0 : i32
    return %arg0, %c0_i32 : i32, i32
  }
}

</mosaic_0001>

<bundles_post_ra>
// kernel: tpu_custom_call.1
= control target key start
LH: loop header
LB: loop body
LE: loop exit
PB: predicated region body
PF: predicated region fallthrough
CT: control target
= control target key end

     0   :  { %12 = vsyncpa [#allocation4], 0  ;;  %s1072_s0 = inlined_call_operand.hbm [shape: f32[32,256], index: 0, kind: input, shape index: {}]   ;;  %s1073_s1 = inlined_call_operand.vmem [shape: f32[4,32], index: 1, kind: input, shape index: {}]   ;;  %s1074_s2 = inlined_call_operand.vmem [shape: f32[1,32], index: 2, kind: input, shape index: {}]   ;;  %s1075_s3 = inlined_call_operand.vmem [shape: f32[32,8], index: 3, kind: input, shape index: {}]   ;;  %s1076_s4 = inlined_call_operand.vmem [shape: f32[1,8], index: 4, kind: input, shape index: {}]   ;;  %s1077_s5 = inlined_call_operand.hbm [shape: f32[8,8], index: 5, kind: output, shape index: {0}]   ;;  %s1078_s6 = inlined_call_operand.vmem [shape: f32[8,4], index: 6, kind: output, shape index: {1}]  }
   0x1   :  { %14 = vsyncpa [#allocation4 + $0x1], 0 }
   0x2   :  { %15 = vsyncpa [#allocation5], 0  ;;  %s895_s21 = smov 0   ;;  %s897_s22 = smov 0  }
   0x3   :  { %s899_s23 = smov 0   ;;  %s901_s24 = smov 0  }
   0x4   :  { %s903_s25 = smov 0   ;;  %s905_s26 = smov 0  }
   0x5 LB: > { %s622_s27 = sadd.s32 4294967295, %s849_s26   ;;  %s30_s28 = sadd.s32 1, %s845_s25  ;;  %s849_s26 = sphi %s905_s26, %s21_s26   ;;  %s845_s25 = sphi %s903_s25, %s1088_s25   ;;  %s841_s24 = sphi %s901_s24, %s1087_s24   ;;  %s837_s23 = sphi %s899_s23, %s1086_s23   ;;  %s833_s22 = sphi %s897_s22, %s1085_s22   ;;  %s829_s21 = sphi %s895_s21, %s1084_s21  }
   0x6   : > { %p31_p0 = scmp.ge.s32.totalorder %s30_s28, 2  ;;  %s42_s29 = sadd.s32 1, %s837_s23 }
   0x7   : > { %p49_p1 = scmp.ne.s32.totalorder %s837_s23, %s833_s22  ;;  %p50_p2 = scmp.eq.s32.totalorder %s849_s26, 0 }
   0x8   : > { %s1090_s28 = smov (%p31_p0, %s30_s28), 0  ;;  %p55_p4 = scmp.ne.s32.totalorder %s833_s22, %s829_s21 }
   0x9   : > { %p931_p3 = por %p50_p2, %p49_p1  ;;  %s38_s7 = ssub.s32 %s845_s25, %s1090_s28 }
   0xa   : > { %p56_p5 = scmp.eq.s32.totalorder %s622_s27, 0  ;;  %p40_p6 = scmp.eq.s32.totalorder %s38_s7, 0 }
   0xb   : > { %p680_p8 = scmp.lt.s32.totalorder %s849_s26, 2  ;;  %s227_s10 = sand.u32 1, %s837_s23  }
   0xc   : > { %p940_p7 = por %p56_p5, %p55_p4  ;;  %s626_s11 = sshll.u32 %s845_s25, 7 }
   0xd   : > { %s946_s9 = scalar_select %p40_p6, %s837_s23, %s42_s29  }
   0xe   : > { %s625_s12 = sshll.u32 %s227_s10, 5  ;;  %s953_s15 = scalar_lea.hbm %s1072_s0, %s626_s11 }
   0xf   : > { %s231_s16 = scalar_lea.vmem [#allocation3], %s625_s12  ;;  %p957_p9 = pnand %p680_p8, %p931_p3 }
  0x10   : > { %s240_s17 = sshll.u32 %s231_s16, 4  ;;  %s964_s19 = scalar_lea.sflag [#allocation4], %s227_s10  ;;  %s961_s17 = int_to_ptr.vmem [resolvable:$true] %s240_s17 }
  0x11   : > { %s739_s20 = scalar_lea.hbm %s953_s15, 512  ;;  %p741_p12 = pneg %p957_p9 }
  0x12   : > { %p740_p11 = scmp.ne.s32.totalorder %s953_s15, %s739_s20  ;;  %s744_s30 = scalar_lea.hbm %s1072_s0, 1024 }
  0x13   : > { %p745_p1 = scmp.lt.u32.totalorder %s953_s15, %s1072_s0  ;;  %p746_p2 = scmp.lt.u32.totalorder %s744_s30, %s739_s20 }
  0x14   : > { %p742_p13 = pnand %p741_p12, %p740_p11  ;;  %p748_p4 = scmp.lt.u32.totalorder %s739_s20, %s953_s15 }
  0x15   : > { %p747_p3 = por %p746_p2, %p745_p1 }
  0x16   : > { %p743_p0 = pneg %p742_p13 }
  0x17   : > { %p749_p5 = por %p748_p4, %p747_p3 }
  0x19   : > { %p750_p6 = pnand %p749_p5, %p743_p0 }
  0x1b   : > { %753 = shalt.err (!%p750_p6)
}
  0x1c   : > { %s754_s10 = scalar_lea.vmem %s961_s17, 512  ;;  %s851_s12 = smov [#allocation3]  }
  0x1d   : > { %p755_p8 = scmp.ne.s32.totalorder %s961_s17, %s754_s10  ;;  %s759_s13 = sshll.u32 %s851_s12, 4  ;;  %s760_s13 = int_to_ptr.vmem [resolvable:$false] %s759_s13 }
  0x1e   : > { %s761_s14 = scalar_lea.vmem %s760_s13, 1024  ;;  %p762_p10 = scmp.lt.s32.totalorder %s961_s17, %s760_s13 }
  0x1f   : > { %p757_p11 = pnand %p755_p8, %p741_p12  ;;  %p763_p1 = scmp.lt.s32.totalorder %s761_s14, %s754_s10 }
  0x21   : > { %p758_p13 = pneg %p757_p11  ;;  %p764_p2 = por %p763_p1, %p762_p10 }
  0x23   : > { %p765_p3 = pnand %p764_p2, %p758_p13 }
  0x25   : > { %768 = shalt.err (!%p765_p3)
}
  0x26   : > { %s852_s16 = smov 256   ;;  %s853_s20 = smov 128  }
  0x27   : > { %s854_s21 = smov 8   ;;  %p248_p12 = scmp.lt.s32.totalorder %s849_s26, 3 }
  0x28   : > { %679 = dma.hbm_to_vmem [thread:$0]  (!%p957_p9), %s953_s15, 512, %s961_s17, %s964_s19, %s852_s16, %s853_s20, %s854_s21  }
  0x29   : > { %p1082_p0 = scmp.ge.s32.totalorder %s849_s26, 1 }
  0x2b   : > { %p249_p4 = pnand %p1082_p0, %p248_p12 }
  0x2c   : > { %s254_s29 = sand.u32 (!%p249_p4), 1, %s833_s22  }
  0x2d   : > { %252 = sbr.rel (%p249_p4) target bundleno = 684 (0x2ac), region = 40  ;;  %s628_s30 = sshll.u32 (!%p249_p4), %s254_s29, 5 }
  0x2e   : > { %s255_s7 = scalar_lea.sflag (!%p249_p4), [#allocation4], %s254_s29  ;;  %s258_s11 = scalar_lea.vmem (!%p249_p4), [#allocation3], %s628_s30 }
  0x34   : > { %820 = dma.done.wait (%p940_p7), %s255_s7, 512  }
  0x35   : > { %822 = vsyncadd (%p940_p7), %s255_s7, 4294966784  ;;  %p629_p10 = scmp.ne.s32.totalorder %s841_s24, 0 }
  0x36   : > { %v855_v0 = vmov (!%p629_p10), 0.0  }
  0x37   : > { %294 = sbr.rel (%p629_p10) target bundleno = 62 (0x3e), region = 48  ;;  %295 = vst [vmem:[#allocation2] sm:$0xff] (!%p629_p10), %v855_v0  ;;  %296 = vst [vmem:[#allocation2 + $0x8] sm:$0xff] (!%p629_p10), %v855_v0 }
  0x38   : > { %297 = vst [vmem:[#allocation2 + $0x10] sm:$0xff] (!%p629_p10), %v855_v0  ;;  %298 = vst [vmem:[#allocation2 + $0x18] sm:$0xff] (!%p629_p10), %v855_v0 }
  0x3e PF: > { %v299_v1 = vld [vmem:[%s258_s11] sm:$0xff]  ;;  %v300_v3 = vld [vmem:[%s258_s11 + $0x8] sm:$0xff]  ;;  %v301_v6 = vld [vmem:[%s258_s11 + $0x10] sm:$0xff]  ;;  %p630_p7 = scmp.ne.s32.totalorder %s841_s24, 1 }
  0x3f   : > { %v303_v2 = vld [vmem:[#allocation2] sm:$0xff]  ;;  %v304_v5 = vld [vmem:[#allocation2 + $0x8] sm:$0xff]  ;;  %v305_v7 = vld [vmem:[#allocation2 + $0x10] sm:$0xff]  ;;  %v856_v17 = vmov (!%p630_p7), 0.0   ;;  %vm357_vm0 = vcmask (!%p630_p7), 1043456   ;;  %vm857_vm1 = vmmov (!%p630_p7), 0   ;;  %v319_v23 = vlaneseq (!%p630_p7) }
  0x40   : > { %v307_v4 = vadd.f32 %v303_v2, %v299_v1  ;;  %v308_v8 = vadd.f32 %v304_v5, %v300_v3  ;;  %v309_v9 = vadd.f32 %v305_v7, %v301_v6  ;;  %v302_v10 = vld [vmem:[%s258_s11 + $0x18] sm:$0xff]  ;;  %318 = sbr.rel (%p630_p7) target bundleno = 659 (0x293), region = 52  ;;  %648 = vmatprep.subr.mxu0 (!%p630_p7), %v856_v17  ;;  %v345_v18 = vld [vmem:[%s1073_s1] sm:$0xf] (!%p630_p7)  ;;  %650 = vmatprep.mubr.msk.f32.mxu0 (!%p630_p7), %vm857_vm1, %v856_v17  ;;  %v435_v20 = vld [vmem:[%s1075_s3 + $0x8] sm:$0xff] (!%p630_p7)  ;;  %v858_v21 = vmov (!%p630_p7), 0.0|0.0  }
  0x41   : > { %v306_v11 = vld [vmem:[#allocation2 + $0x18] sm:$0xff]  ;;  %649 = vmatpush3.msk.msra.mxu0 (!%p630_p7), %vm357_vm0, %v345_v18  ;;  %v434_v19 = vld [vmem:[%s1075_s3] sm:$0xff] (!%p630_p7)  ;;  %661 = vmatprep.mubr.msk.f32.mxu1 (!%p630_p7), %vm857_vm1, %v856_v17  ;;  %v320_v24 = vand.u32 (!%p630_p7), 127, %v319_v23  ;;  %vm353_vm6 = vcmask (!%p630_p7), 31744   ;;  %v436_v34 = vld [vmem:[%s1075_s3 + $0x10] sm:$0xff] (!%p630_p7)  ;;  %vm445_vm8 = vcmask (!%p630_p7), 261120  }
  0x42   : > { %311 = vst [vmem:[#allocation2] sm:$0xff] %v307_v4  ;;  %v310_v12 = vadd.f32 %v306_v11, %v302_v10  ;;  %312 = vst [vmem:[#allocation2 + $0x8] sm:$0xff] %v308_v8  ;;  %664 = vmatprep.subr.bf16.mxu1 (!%p630_p7), %v858_v21  ;;  %v665_v22 = vpack.c.bf16 (!%p630_p7), %v435_v20, %v434_v19  ;;  %v437_v35 = vld [vmem:[%s1075_s3 + $0x18] sm:$0xff] (!%p630_p7)  ;;  %v631_v37 = vld [vmem:[%s1074_s2] ss:$0 sm:$0xff] (!%p630_p7)  ;;  %vm519_vm9 = vcmask (!%p630_p7), 64512  }
  0x43   : > { %313 = vst [vmem:[#allocation2 + $0x10] sm:$0xff] %v309_v9  ;;  %vm324_vm2 = vcmp.eq.s32.totalorder (!%p630_p7), %v320_v24, 0  ;;  %vm330_vm3 = vcmp.eq.s32.totalorder (!%p630_p7), %v320_v24, 1  ;;  %vm336_vm4 = vcmp.eq.s32.totalorder (!%p630_p7), %v320_v24, 2  ;;  %vm342_vm5 = vcmp.eq.s32.totalorder (!%p630_p7), %v320_v24, 3 }
  0x44   : > { %314 = vst [vmem:[#allocation2 + $0x18] sm:$0xff] %v310_v12  ;;  %666 = vmatpush3.bf16.msra.mxu1 (!%p630_p7), %v665_v22  ;;  %v668_v36 = vpack.c.bf16 (!%p630_p7), %v437_v35, %v436_v34  ;;  %v634_v43 = vld [vmem:[%s1076_s4] ss:$0 sm:$0xff] (!%p630_p7) }
  0x45   : > { %667 = vmatprep.subr.bf16.mxu1 (!%p630_p7), %v858_v21 }
  0x48   : > { %669 = vmatpush3.bf16.msra.mxu1 %v668_v36 }
  0x4b   : > { %v321_v13 = vld [vmem:[#allocation2] ss:$4 sm:$0xff]  ;;  %v333_v14 = vld [vmem:[#allocation2 + $0x2] ss:$4 sm:$0xff]  ;;  %v327_v15 = vld [vmem:[#allocation2 + $0x1] ss:$4 sm:$0xff] }
  0x4c   : > { %322 = vadd.xlane.f32.xlu0 %v321_v13  ;;  %334 = vadd.xlane.f32.xlu1 %v333_v14  ;;  %v339_v16 = vld [vmem:[#allocation2 + $0x3] ss:$4 sm:$0xff] }
  0x50   : > { %328 = vadd.xlane.f32.xlu0 %v327_v15  ;;  %340 = vadd.xlane.f32.xlu1 %v339_v16 }
  0xd9   : > { %v323_v25 = vpop.xlane.xlu0 %322  ;;  %v335_v26 = vpop.xlane.xlu1 %334 }
  0xda   : > { %v325_v27 = vsel %vm324_vm2, %v323_v25, 0.0 }
  0xdd   : > { %v329_v28 = vpop.xlane.xlu0 %328  ;;  %v341_v29 = vpop.xlane.xlu1 %340 }
  0xde   : > { %v331_v30 = vsel %vm330_vm3, %v329_v28, %v325_v27 }
  0xdf   : > { %v337_v31 = vsel %vm336_vm4, %v335_v26, %v331_v30 }
  0xe0   : > { %v343_v32 = vsel %vm342_vm5, %v341_v29, %v337_v31 }
  0xe1   : > { %v344_v33 = vmul.f32 0.00390625, %v343_v32 }
  0xe3   : > { %651 = vmatmul.mubr.msk.f32.vlgmr.msra.gmra.mrb[0].mxu0 %vm353_vm6, %v344_v33  ;;  %521 = vst.msk [vmem:[%s1078_s6] sm:$0xff] %vm353_vm6, %v344_v33 }
 0x1b6   : > { %v427_v38 = vpop.f32.mrb[0].mxu0 }
 0x1b7   : > { %v428_v39 = vadd.f32 %v631_v37, %v427_v38  ;;  %v652_v40 = vpop.f32.mrb[1].mxu0 }
 0x1b9   : > { %vm431_vm7 = vcmp.gt.f32.partialorder %v428_v39, 0.0  ;;  %v432_v41 = vmul.f32 0.01, %v428_v39 }
 0x1bb   : > { %v433_v42 = vsel %vm431_vm7, %v428_v39, %v432_v41 }
 0x1bc   : > { %662 = vmatmul.mubr.msk.f32.vlgmr.msra.gmra.mrb[0].mxu1 %vm445_vm8, %v433_v42 }
 0x28f   : > { %v515_v44 = vpop.f32.mrb[0].mxu1 }
 0x290   : > { %v516_v45 = vadd.f32 %v634_v43, %v515_v44  ;;  %v663_v46 = vpop.f32.mrb[1].mxu1 }
 0x292   : > { %520 = vst.msk [vmem:[#allocation6] sm:$0xff] %vm519_vm9, %v516_v45 }
 0x293 PF: > { %p1028_p9 = scmp.eq.s32.totalorder %s622_s27, 1  ;;  %s859_s8 = smov [#allocation6]  }
 0x294   : > { %s535_s15 = sshll.u32 %s859_s8, 4  ;;  %s536_s15 = int_to_ptr.vmem [resolvable:$true] %s535_s15 }
 0x295   : > { %s769_s24 = scalar_lea.vmem %s536_s15, 128  ;;  %p776_p11 = scmp.lt.s32.totalorder %s536_s15, %s536_s15 }
 0x296   : > { %p770_p5 = scmp.ne.s32.totalorder %s536_s15, %s769_s24  ;;  %p777_p13 = scmp.lt.s32.totalorder %s769_s24, %s769_s24 }
 0x298   : > { %p771_p6 = pnand %p770_p5, %p1028_p9  ;;  %p778_p1 = por %p777_p13, %p776_p11 }
 0x29a   : > { %p772_p8 = pneg %p771_p6 }
 0x29c   : > { %p779_p2 = pnand %p778_p1, %p772_p8 }
 0x29e   : > { %782 = shalt.err (!%p779_p2)
}
 0x29f   : > { %s783_s27 = scalar_lea.hbm %s1077_s5, 128 }
 0x2a0   : > { %p784_p3 = scmp.ne.s32.totalorder %s1077_s5, %s783_s27  ;;  %p789_p4 = scmp.lt.u32.totalorder %s783_s27, %s1077_s5 }
 0x2a2   : > { %p785_p12 = pnand %p784_p3, %p1028_p9 }
 0x2a4   : > { %p786_p0 = pneg %p785_p12 }
 0x2a6   : > { %p791_p10 = pnand %p789_p4, %p786_p0 }
 0x2a8   : > { %794 = shalt.err (!%p791_p10)
}
 0x2a9   : > { %673 = dma.vmem_to_hbm [thread:$0]  (%p1028_p9), %s536_s15, 128, %s1077_s5, [#allocation5]  }
 0x2aa   : > { %824 = dma.done.wait (%p1028_p9), [#allocation5], 128  }
 0x2ab   : > { %826 = vsyncadd (%p1028_p9), [#allocation5], 4294967168 }
 0x2ac PF: > { %s21_s26 = sadd.s32 1, %s849_s26   ;;  %s1084_s21 = smov %s833_s22 }
 0x2ad   : > { %p18_p7 = scmp.ge.s32.totalorder %s21_s26, 4   ;;  %s1085_s22 = smov %s837_s23 }
 0x2ae   : > { %s1086_s23 = smov %s946_s9  ;;  %s1087_s24 = smov %s845_s25 }
 0x2af   : > { %s1088_s25 = smov %s1090_s28  ;;  %20 = sbr.rel (!%p18_p7) target bundleno = 5 (0x5), region = 101 }
 0x2b6   :  { %558 = vsyncpa [#allocation4], 1 }
 0x2b7   :  { %560 = vsyncpa [#allocation4 + $0x1], 1 }
 0x2b8   :  { %561 = vsyncpa [#allocation5], 1 }
 0x2b9   :  { %563 = vsyncpa [#allocation5 + $0x1], 1 }

</bundles_post_ra>
